<compile_context>
chip_gen: v5e
topology: v5e:2x2
jax: 0.10.0
libtpu: 0.0.40
codegen_flags: <defaults>
</compile_context>

<pallas_src>
import functools

import jax
import jax.numpy as jnp
import numpy as np
from jax.experimental import pallas as pl
from jax.experimental.pallas import tpu as pltpu


def _round_up(x, m):
    return (x + m - 1) // m * m


def _sincos_kernel(x_ref, wt_ref, b_ref, out_ref, *, omega, matmul_dtype):
    x = x_ref[...]
    w = wt_ref[...]
    if matmul_dtype is not None:
        # bf16 operands keep the MXU on its fast path; accumulation stays f32.
        x = x.astype(matmul_dtype)
        w = w.astype(matmul_dtype)
    arg = jnp.dot(x, w, preferred_element_type=jnp.float32)
    # Bias + omega scale + sin/cos stay in f32 (v5e VPU/EUP are f32-only).
    arg = omega * (arg + b_ref[...].astype(jnp.float32))
    fused = jnp.concatenate([jnp.sin(arg), jnp.cos(arg)], axis=-1)
    out_ref[...] = fused.astype(out_ref.dtype)


def _pick_row_tile(n, fin, fout, x_bytes, w_bytes, out_bytes, budget_bytes):
    """Largest row tile (multiple of 8, <= 512) that fits the VMEM budget."""
    fixed = fin * fout * w_bytes + fout * 4                     # resident W + bias
    per_row = 2 * fin * x_bytes + 2 * (2 * fout) * out_bytes    # dbl-buffered x/out
    avail = max(budget_bytes - 2 * fixed, 8 * per_row)
    tm = min(512, avail // per_row, _round_up(n, 8))
    return max(8, int(tm) // 8 * 8)


def sincos_layer(x, wt, bias, omega, *, tm=None, out_dtype=None,
                 matmul_dtype=None, fused_output=False,
                 vmem_budget_bytes=24 * 1024 * 1024):
    """SIREN sin/cos layer.

    x:    [N, fin]
    wt:   [fin, fout]  (already transposed; == weight.T of the nn.Linear)
    bias: [fout]
    Returns (sin, cos), each [N, fout]; or the fused [N, 2*fout] slab if
    fused_output=True (sin in [:, :fout], cos in [:, fout:]).
    """
    n, fin = x.shape
    fin_w, fout = wt.shape
    assert fin_w == fin, "weight must be [fin, fout]"
    out_dtype = x.dtype if out_dtype is None else jnp.dtype(out_dtype)

    x_bytes = jnp.dtype(x.dtype).itemsize
    w_bytes = jnp.dtype(matmul_dtype).itemsize if matmul_dtype is not None \
        else jnp.dtype(wt.dtype).itemsize
    out_bytes = jnp.dtype(out_dtype).itemsize

    if tm is None:
        tm = _pick_row_tile(n, fin, fout, x_bytes, w_bytes, out_bytes,
                            vmem_budget_bytes)
    tm = max(8, _round_up(min(tm, _round_up(n, 8)), 8))

    n_pad = _round_up(n, tm)
    if n_pad != n:
        x = jnp.pad(x, ((0, n_pad - n), (0, 0)))
    grid = (n_pad // tm,)

    b2 = bias.reshape(1, fout)
    if matmul_dtype is not None:
        # Cast the resident weight once in the wrapper (halves its DMA bytes
        # and VMEM footprint); x is cast at load inside the kernel so we don't
        # pay an extra HBM round-trip for it.
        wt = wt.astype(matmul_dtype)

    kernel = functools.partial(_sincos_kernel, omega=float(omega),
                               matmul_dtype=matmul_dtype)
    out_shape = jax.ShapeDtypeStruct((n_pad, 2 * fout), out_dtype)

    # Explicit VMEM budget: double-buffered x tile + outputs, resident weights.
    vmem_needed = (2 * tm * fin * x_bytes
                   + 2 * fin * fout * w_bytes
                   + 2 * tm * 2 * fout * out_bytes
                   + 8 * 128 * 4)  # padded bias block
    vmem_limit = int(min(48 * 1024 * 1024,
                         max(vmem_needed + (8 << 20), 16 << 20)))

    x_spec = pl.BlockSpec((tm, fin), lambda i: (i, 0))
    out_spec = pl.BlockSpec((tm, 2 * fout), lambda i: (i, 0))

    def build(single_buffer_params):
        extra = {"pipeline_mode": pl.Buffered(1)} if single_buffer_params else {}
        wt_spec = pl.BlockSpec((fin, fout), lambda i: (0, 0), **extra)
        b_spec = pl.BlockSpec((1, fout), lambda i: (0, 0), **extra)
        return pl.pallas_call(
            kernel,
            out_shape=out_shape,
            grid_spec=pltpu.PrefetchScalarGridSpec(
                num_scalar_prefetch=0,
                grid=grid,
                in_specs=[x_spec, wt_spec, b_spec],
                out_specs=out_spec,
            ),
            compiler_params=pltpu.CompilerParams(
                dimension_semantics=("parallel",),   # shards rows across TCs on v7x
                vmem_limit_bytes=vmem_limit,
            ),
        )

    try:
        fused = build(True)(x, wt, b2)
    except Exception:
        # Fallback if this jax build rejects single-buffered (Buffered(1)) specs.
        fused = build(False)(x, wt, b2)

    fused = fused[:n]
    if fused_output:
        return fused
    return fused[:, :fout], fused[:, fout:]


def init_sincos_params(key, fin, fout, omega, is_first):
    """Deterministic init matching SinCosLayer.__init__ distributions.

    Returns the weight already transposed as [fin, fout] (same distribution,
    no per-call transpose needed) and the bias [fout].
    """
    kw, kb = jax.random.split(key)
    if is_first:
        wlim = 1.0 / fin
    else:
        wlim = float(np.sqrt(6.0 / fin) / omega)
    wt = jax.random.uniform(kw, (fin, fout), jnp.float32, -wlim, wlim)
    # nn.Linear default bias init: U(-1/sqrt(fin), 1/sqrt(fin))
    blim = 1.0 / float(np.sqrt(fin))
    bias = jax.random.uniform(kb, (fout,), jnp.float32, -blim, blim)
    return wt, bias


if __name__ == "__main__":
    key = jax.random.PRNGKey(0)
    kx, kp = jax.random.split(key)

    batch, fin, fout = 12, 32, 64      # batch deliberately NOT a multiple of 8
    omega = 30.0

    x = jax.random.normal(kx, (batch, fin), jnp.float32)
    wt, bias = init_sincos_params(kp, fin, fout, omega, is_first=True)

    # ---- f32 path: exact check against the reference ----
    sin_out, cos_out = sincos_layer(x, wt, bias, omega)
    sin_out = jax.block_until_ready(sin_out)
    cos_out = jax.block_until_ready(cos_out)

    arg_ref = omega * (np.asarray(x) @ np.asarray(wt) + np.asarray(bias))
    np.testing.assert_allclose(np.asarray(sin_out), np.sin(arg_ref),
                               rtol=1e-5, atol=1e-5)
    np.testing.assert_allclose(np.asarray(cos_out), np.cos(arg_ref),
                               rtol=1e-5, atol=1e-5)

    # ---- bf16-operand / bf16-output path (v6e / v7x fast path) ----
    sin_bf, cos_bf = sincos_layer(x, wt, bias, omega,
                                  matmul_dtype=jnp.bfloat16,
                                  out_dtype=jnp.bfloat16)
    sin_bf = jax.block_until_ready(sin_bf)
    cos_bf = jax.block_until_ready(cos_bf)

    xb = np.asarray(x.astype(jnp.bfloat16).astype(jnp.float32))
    wb = np.asarray(wt.astype(jnp.bfloat16).astype(jnp.float32))
    arg_bf = omega * (xb @ wb + np.asarray(bias))
    np.testing.assert_allclose(np.asarray(sin_bf, dtype=np.float32),
                               np.sin(arg_bf), atol=2e-2)
    np.testing.assert_allclose(np.asarray(cos_bf, dtype=np.float32),
                               np.cos(arg_bf), atol=2e-2)

    print("KERNEL_OK")
</pallas_src>

<mosaic_0001>
module attributes {stable_mosaic.version = 11 : i64} {
  func.func @_sincos_kernel(%arg0: i32, %arg1: memref<16x32xf32, #tpu.memory_space<vmem>>, %arg2: memref<32x64xf32, #tpu.memory_space<vmem>>, %arg3: memref<1x64xf32, #tpu.memory_space<vmem>>, %arg4: memref<16x128xf32, #tpu.memory_space<vmem>>) attributes {dimension_semantics = [#tpu.dimension_semantics<parallel>], iteration_bounds = array<i64: 1>, scalar_prefetch = 0 : i64, scratch_operands = 0 : i64, tpu.core_type = #tpu.core_type<tc>, window_params = [{transform_indices = @transform_0, window_bounds = array<i64: 16, 32>}, {pipeline_mode = #tpu.pipeline_mode<synchronous>, transform_indices = @transform_1, window_bounds = array<i64: 32, 64>}, {pipeline_mode = #tpu.pipeline_mode<synchronous>, transform_indices = @transform_2, window_bounds = array<i64: 1, 64>}, {transform_indices = @transform_3, window_bounds = array<i64: 16, 128>}]} {
    %c0 = arith.constant 0 : index
    %c0_0 = arith.constant 0 : index
    %0 = vector.load %arg1[%c0, %c0_0] : memref<16x32xf32, #tpu.memory_space<vmem>>, vector<16x32xf32>
    %c0_1 = arith.constant 0 : index
    %c0_2 = arith.constant 0 : index
    %1 = vector.load %arg2[%c0_1, %c0_2] : memref<32x64xf32, #tpu.memory_space<vmem>>, vector<32x64xf32>
    %cst = arith.constant dense<0.000000e+00> : vector<16x64xf32>
    %2 = tpu.matmul %0, %1, %cst {dimension_numbers = #tpu.dot_dimension_numbers<[1], [0], [0], [1], [0, 0, 1, 1], [], []>} : vector<16x32xf32>, vector<32x64xf32>, vector<16x64xf32> -> vector<16x64xf32>
    %c0_3 = arith.constant 0 : index
    %c0_4 = arith.constant 0 : index
    %3 = vector.load %arg3[%c0_3, %c0_4] : memref<1x64xf32, #tpu.memory_space<vmem>>, vector<1x64xf32>
    %4 = vector.broadcast %3 : vector<1x64xf32> to vector<16x64xf32>
    %5 = arith.addf %2, %4 : vector<16x64xf32>
    %cst_5 = arith.constant 3.000000e+01 : f32
    %6 = vector.broadcast %cst_5 : f32 to vector<16x64xf32>
    %7 = arith.mulf %6, %5 : vector<16x64xf32>
    %8 = math.sin %7 : vector<16x64xf32>
    %9 = math.cos %7 : vector<16x64xf32>
    %10 = tpu.concatenate %8, %9 in 1 : vector<16x64xf32>, vector<16x64xf32> -> vector<16x128xf32>
    %c0_6 = arith.constant 0 : index
    %c0_7 = arith.constant 0 : index
    %11 = vector.load %arg4[%c0_6, %c0_7] : memref<16x128xf32, #tpu.memory_space<vmem>>, vector<16x128xf32>
    tpu.vector_store %arg4[%c0_6, %c0_7], %10 {strides = array<i32>} : memref<16x128xf32, #tpu.memory_space<vmem>>, vector<16x128xf32>,
    return
  }
  func.func @transform_0(%arg0: i32) -> (i32, i32) {
    %c0_i32 = arith.constant 0 : i32
    %c0_i32_0 = arith.constant 0 : i32
    return %arg0, %c0_i32 : i32, i32
  }
  func.func @transform_1(%arg0: i32) -> (i32, i32) {
    %c0_i32 = arith.constant 0 : i32
    %c0_i32_0 = arith.constant 0 : i32
    %c0_i32_1 = arith.constant 0 : i32
    return %c0_i32, %c0_i32_0 : i32, i32
  }
  func.func @transform_2(%arg0: i32) -> (i32, i32) {
    %c0_i32 = arith.constant 0 : i32
    %c0_i32_0 = arith.constant 0 : i32
    %c0_i32_1 = arith.constant 0 : i32
    return %c0_i32, %c0_i32_0 : i32, i32
  }
  func.func @transform_3(%arg0: i32) -> (i32, i32) {
    %c0_i32 = arith.constant 0 : i32
    %c0_i32_0 = arith.constant 0 : i32
    return %arg0, %c0_i32 : i32, i32
  }
}

module attributes {stable_mosaic.version = 11 : i64} {
  func.func @_sincos_kernel(%arg0: i32, %arg1: memref<16x32xf32, #tpu.memory_space<vmem>>, %arg2: memref<32x64xf32, #tpu.memory_space<vmem>>, %arg3: memref<1x64xf32, #tpu.memory_space<vmem>>, %arg4: memref<16x128xf32, #tpu.memory_space<vmem>>) attributes {dimension_semantics = [#tpu.dimension_semantics<parallel>], iteration_bounds = array<i64: 1>, scalar_prefetch = 0 : i64, scratch_operands = 0 : i64, tpu.core_type = #tpu.core_type<tc>, window_params = [{transform_indices = @transform_0, window_bounds = array<i64: 16, 32>}, {pipeline_mode = #tpu.pipeline_mode<synchronous>, transform_indices = @transform_1, window_bounds = array<i64: 32, 64>}, {pipeline_mode = #tpu.pipeline_mode<synchronous>, transform_indices = @transform_2, window_bounds = array<i64: 1, 64>}, {transform_indices = @transform_3, window_bounds = array<i64: 16, 128>}]} {
    %c0 = arith.constant 0 : index
    %c0_0 = arith.constant 0 : index
    %0 = vector.load %arg1[%c0, %c0_0] : memref<16x32xf32, #tpu.memory_space<vmem>>, vector<16x32xf32>
    %c0_1 = arith.constant 0 : index
    %c0_2 = arith.constant 0 : index
    %1 = vector.load %arg2[%c0_1, %c0_2] : memref<32x64xf32, #tpu.memory_space<vmem>>, vector<32x64xf32>
    %cst = arith.constant dense<0.000000e+00> : vector<16x64xf32>
    %2 = tpu.matmul %0, %1, %cst {dimension_numbers = #tpu.dot_dimension_numbers<[1], [0], [0], [1], [0, 0, 1, 1], [], []>} : vector<16x32xf32>, vector<32x64xf32>, vector<16x64xf32> -> vector<16x64xf32>
    %c0_3 = arith.constant 0 : index
    %c0_4 = arith.constant 0 : index
    %3 = vector.load %arg3[%c0_3, %c0_4] : memref<1x64xf32, #tpu.memory_space<vmem>>, vector<1x64xf32>
    %4 = vector.broadcast %3 : vector<1x64xf32> to vector<16x64xf32>
    %5 = arith.addf %2, %4 : vector<16x64xf32>
    %cst_5 = arith.constant 3.000000e+01 : f32
    %6 = vector.broadcast %cst_5 : f32 to vector<16x64xf32>
    %7 = arith.mulf %6, %5 : vector<16x64xf32>
    %8 = math.sin %7 : vector<16x64xf32>
    %9 = math.cos %7 : vector<16x64xf32>
    %10 = tpu.concatenate %8, %9 in 1 : vector<16x64xf32>, vector<16x64xf32> -> vector<16x128xf32>
    %c0_6 = arith.constant 0 : index
    %c0_7 = arith.constant 0 : index
    %11 = vector.load %arg4[%c0_6, %c0_7] : memref<16x128xf32, #tpu.memory_space<vmem>>, vector<16x128xf32>
    tpu.vector_store %arg4[%c0_6, %c0_7], %10 {strides = array<i32>} : memref<16x128xf32, #tpu.memory_space<vmem>>, vector<16x128xf32>,
    return
  }
  func.func @transform_0(%arg0: i32) -> (i32, i32) {
    %c0_i32 = arith.constant 0 : i32
    %c0_i32_0 = arith.constant 0 : i32
    return %arg0, %c0_i32 : i32, i32
  }
  func.func @transform_1(%arg0: i32) -> (i32, i32) {
    %c0_i32 = arith.constant 0 : i32
    %c0_i32_0 = arith.constant 0 : i32
    %c0_i32_1 = arith.constant 0 : i32
    return %c0_i32, %c0_i32_0 : i32, i32
  }
  func.func @transform_2(%arg0: i32) -> (i32, i32) {
    %c0_i32 = arith.constant 0 : i32
    %c0_i32_0 = arith.constant 0 : i32
    %c0_i32_1 = arith.constant 0 : i32
    return %c0_i32, %c0_i32_0 : i32, i32
  }
  func.func @transform_3(%arg0: i32) -> (i32, i32) {
    %c0_i32 = arith.constant 0 : i32
    %c0_i32_0 = arith.constant 0 : i32
    return %arg0, %c0_i32 : i32, i32
  }
}

</mosaic_0001>

<bundles_post_ra>
// kernel: tpu_custom_call.1
= control target key start
LH: loop header
LB: loop body
LE: loop exit
PB: predicated region body
PF: predicated region fallthrough
CT: control target
= control target key end

     0   :  { %8 = vsyncpa [#allocation3], 0  ;;  %s1074_s0 = inlined_call_operand.hbm [shape: f32[16,32], index: 0, kind: input, shape index: {}]   ;;  %s1075_s1 = inlined_call_operand.hbm [shape: f32[32,64], index: 1, kind: input, shape index: {}]   ;;  %s1076_s2 = inlined_call_operand.vmem [shape: f32[1,64], index: 2, kind: input, shape index: {}]   ;;  %s1077_s3 = inlined_call_operand.hbm [shape: f32[16,128], index: 3, kind: output, shape index: {}]  }
   0x1   :  { %9 = vsyncpa [#allocation6], 0 }
   0x2   :  { %10 = vsyncpa [#allocation4], 0  ;;  %s15_s14 = sshll.u32 %s1074_s0, 4  ;;  %s850_s15 = smov [#allocation2]   ;;  %s16_s14 = int_to_ptr.hbm [resolvable:$true] %s15_s14 }
   0x3   :  { %s17_s16 = sshll.u32 %s850_s15, 4  ;;  %s28_s19 = sshll.u32 %s1075_s1, 4  ;;  %s18_s16 = int_to_ptr.vmem [resolvable:$true] %s17_s16  ;;  %s29_s19 = int_to_ptr.hbm [resolvable:$true] %s28_s19 }
   0x4   :  { %s851_s20 = smov 128   ;;  %s852_s21 = smov 8  }
   0x5   :  { %23 = dma.hbm_to_vmem [thread:$0]  %s16_s14, 256, %s18_s16, [#allocation3], %s851_s20, %s851_s20, %s852_s21  }
   0x6   :  { %s853_s22 = smov [#allocation5]  }
   0x7   :  { %s30_s23 = sshll.u32 %s853_s22, 4  ;;  %s31_s23 = int_to_ptr.vmem [resolvable:$true] %s30_s23 }
   0x8   :  { %36 = dma.hbm_to_vmem [thread:$0]  %s29_s19, 512, %s31_s23, [#allocation6], %s851_s20, %s851_s20, %s852_s21  }
   0x9   :  { %844 = dma.done.wait [#allocation3], 256  }
   0xa   :  { %845 = vsyncadd [#allocation3], 4294967040 }
   0xb   :  { %846 = dma.done.wait [#allocation6], 512  }
   0xc   :  { %847 = vsyncadd [#allocation6], 4294966784  ;;  %v52_v0 = vld [vmem:[#allocation5 + $0x18] sm:$0xff]  ;;  %v51_v1 = vld [vmem:[#allocation5 + $0x10] sm:$0xff]  ;;  %vm57_vm0 = vcmask 261120   ;;  %s862_s24 = smov [#allocation7]  }
   0xd   :  { %76 = vmatpush.msra.mxu0 %v52_v0  ;;  %754 = vmatpush.msra.mxu1 %v52_v0  ;;  %v50_v2 = vld [vmem:[#allocation5 + $0x8] sm:$0xff]  ;;  %v49_v3 = vld [vmem:[#allocation5] sm:$0xff]  ;;  %v47_v4 = vld [vmem:[#allocation2] sm:$0xff]  ;;  %v854_v35 = vmov 2102212464   ;;  %s724_s25 = sshll.u32 %s862_s24, 4  ;;  %s725_s25 = int_to_ptr.vmem [resolvable:$true] %s724_s25 }
   0xe   :  { %v48_v5 = vld [vmem:[#allocation2 + $0x8] sm:$0xff]  ;;  %v771_v6 = vld [vmem:[%s1076_s2] ss:$0 sm:$0xff]  ;;  %v855_v37 = vmov 920167782   ;;  %s861_s2 = smov 64  }
   0xf   :  { %77 = vmatpush.msra.mxu0 %v51_v1  ;;  %755 = vmatpush.msra.mxu1 %v51_v1  ;;  %v856_v42 = vmov 1326507024   ;;  %v857_v48 = vmov 683565275   ;;  %v858_v50 = vmov 2475754826  }
  0x10   :  { %v859_v55 = vmov 2131351028   ;;  %s726_s28 = sshll.u32 %s1077_s3, 4  ;;  %s727_s28 = int_to_ptr.hbm [resolvable:$true] %s726_s28 }
  0x11   :  { %78 = vmatpush.msra.mxu0 %v50_v2  ;;  %756 = vmatpush.msra.mxu1 %v50_v2 }
  0x13   :  { %79 = vmatpush.msra.mxu0 %v49_v3  ;;  %757 = vmatpush.msra.mxu1 %v49_v3 }
  0x14   :  { %740 = vmatmul.msk.f32.vlgmr.msra.gmra.mxu0 %vm57_vm0, %v47_v4  ;;  %741 = vmatmul.msk.f32.vlgmr.msra.gmra.mxu1 %vm57_vm0, %v48_v5 }
  0x91   :  { %v81_v7 = vpop.f32.mrf.mxu0  ;;  %v84_v8 = vpop.f32.mrf.mxu1 }
  0x92   :  { %v82_v9 = vadd.f32 %v771_v6, %v81_v7  ;;  %v85_v10 = vadd.f32 %v771_v6, %v84_v8 }
  0x94   :  { %v898_v11 = vmul.f32 30.0, %v82_v9  ;;  %v900_v12 = vmul.f32 30.0, %v85_v10 }
  0x96   :  { %v92_v13 = vand.u32 2139095040, %v898_v11  ;;  %v247_v14 = vand.u32 2139095040, %v900_v12  ;;  %v89_v15 = vand.u32 2147483647, %v898_v11  ;;  %v244_v16 = vand.u32 2147483647, %v900_v12 }
  0x98   :  { %v93_v17 = vshrl.u32 %v92_v13, 23  ;;  %v248_v18 = vshrl.u32 %v247_v14, 23  ;;  %v96_v21 = vand.u32 8388607, %v89_v15  ;;  %v251_v22 = vand.u32 8388607, %v244_v16 }
  0x9a   :  { %v742_v19 = vadd.s32 4294967169, %v93_v17  ;;  %v745_v20 = vadd.s32 4294967169, %v248_v18  ;;  %v97_v25 = vor.u32 8388608, %v96_v21  ;;  %v252_v26 = vor.u32 8388608, %v251_v22 }
  0x9c   :  { %v99_v23 = vadd.s32 1, %v742_v19  ;;  %v254_v24 = vadd.s32 1, %v745_v20  ;;  %v914_v33 = vshll.u32 %v97_v25, 8  ;;  %v916_v34 = vshll.u32 %v252_v26, 8 }
  0x9e   :  { %vm100_vm1 = vcmp.gt.s32.totalorder %v99_v23, 0  ;;  %vm255_vm2 = vcmp.gt.s32.totalorder %v254_v24, 0  ;;  %v138_v63 = vand.u32 65535, %v914_v33  ;;  %v139_v13 = vshrl.u32 %v914_v33, 16 }
  0x9f   :  { %v101_v27 = vsel %vm100_vm1, %v99_v23, 0  ;;  %v256_v28 = vsel %vm255_vm2, %v254_v24, 0 }
  0xa0   :  { %v103_v29 = vand.u32 31, %v101_v27  ;;  %v910_v30 = vand.u32 31, %v256_v28  ;;  %v912_v31 = vshrl.u32 %v101_v27, 5  ;;  %v919_v39 = vshrl.u32 %v256_v28, 5 }
  0xa2   :  { %v104_v32 = vsub.s32 32, %v103_v29  ;;  %v115_v36 = vshll.u32 %v854_v35, %v103_v29  ;;  %v118_v38 = vshll.u32 %v855_v37, %v103_v29  ;;  %v922_v40 = vsub.s32 32, %v910_v30 }
  0xa3   :  { %v270_v44 = vshll.u32 %v854_v35, %v910_v30  ;;  %v273_v45 = vshll.u32 %v855_v37, %v910_v30  ;;  %v106_v49 = vshll.u32 %v857_v48, %v103_v29  ;;  %v109_v54 = vshll.u32 %v858_v50, %v103_v29 }
  0xa4   :  { %v116_v41 = vshrl.u32 %v855_v37, %v104_v32  ;;  %v119_v43 = vshrl.u32 %v856_v42, %v104_v32  ;;  %v271_v46 = vshrl.u32 %v855_v37, %v922_v40  ;;  %v274_v47 = vshrl.u32 %v856_v42, %v922_v40 }
  0xa5   :  { %v107_v51 = vshrl.u32 %v858_v50, %v104_v32  ;;  %v110_v56 = vshrl.u32 %v859_v55, %v104_v32  ;;  %vm124_vm3 = vcmp.lt.s32.totalorder %v912_v31, 4  ;;  %v112_v58 = vshll.u32 %v859_v55, %v103_v29 }
  0xa6   :  { %v117_v52 = vor.u32 %v116_v41, %v115_v36  ;;  %v120_v53 = vor.u32 %v119_v43, %v118_v38  ;;  %v113_v59 = vshrl.u32 %v854_v35, %v104_v32  ;;  %v937_v0 = vor.u32 %v271_v46, %v270_v44 }
  0xa7   :  { %v108_v57 = vor.u32 %v107_v51, %v106_v49  ;;  %v111_v62 = vor.u32 %v110_v56, %v109_v54  ;;  %vm279_vm4 = vcmp.lt.s32.totalorder %v919_v39, 4  ;;  %vm121_vm5 = vcmp.lt.s32.totalorder %v912_v31, 1 }
  0xa8   :  { %v130_v60 = vsel %vm124_vm3, %v117_v52, 920167782  ;;  %v134_v61 = vsel %vm124_vm3, %v120_v53, 1326507024  ;;  %v114_v1 = vor.u32 %v113_v59, %v112_v58  ;;  %v275_v2 = vor.u32 %v274_v47, %v273_v45 }
  0xa9   :  { %vm122_vm6 = vcmp.lt.s32.totalorder %v912_v31, 2  ;;  %vm123_vm7 = vcmp.lt.s32.totalorder %v912_v31, 3  ;;  %v129_v3 = vsel %vm121_vm5, %v108_v57, %v111_v62  ;;  %v105_v8 = vshrl.u32 %v857_v48, %v104_v32 }
  0xaa   :  { %v126_v4 = vsel %vm124_vm3, %v114_v1, 2102212464  ;;  %v131_v5 = vsel %vm123_vm7, %v114_v1, %v130_v60  ;;  %v133_v6 = vsel %vm121_vm5, %v111_v62, %v114_v1  ;;  %v135_v7 = vsel %vm123_vm7, %v117_v52, %v134_v61 }
  0xab   :  { %v132_v9 = vsel %vm122_vm6, %v129_v3, %v131_v5  ;;  %v136_v10 = vsel %vm122_vm6, %v133_v6, %v135_v7  ;;  %v285_v14 = vsel %vm279_vm4, %v937_v0, 920167782  ;;  %v289_v20 = vsel %vm279_vm4, %v275_v2, 1326507024 }
  0xac   :  { %v140_v17 = vand.u32 65535, %v136_v10  ;;  %v141_v18 = vshrl.u32 %v136_v10, 16  ;;  %v162_v19 = vand.u32 65535, %v132_v9  ;;  %v125_v21 = vsel %vm121_vm5, %v105_v8, %v108_v57 }
  0xad   :  { %v127_v22 = vsel %vm123_vm7, %v111_v62, %v126_v4  ;;  %v163_v23 = vshrl.u32 %v132_v9, 16  ;;  %v261_v26 = vshll.u32 %v857_v48, %v910_v30  ;;  %v262_v27 = vshrl.u32 %v858_v50, %v922_v40 }
  0xae   :  { %v143_v24 = vmul.u32 %v141_v18, %v138_v63  ;;  %v144_v25 = vmul.u32 %v140_v17, %v139_v13  ;;  %v142_v28 = vmul.u32 %v140_v17, %v138_v63  ;;  %v166_v32 = vmul.u32 %v162_v19, %v139_v13 }
  0xaf   :  { %v165_v29 = vmul.u32 %v163_v23, %v138_v63  ;;  %v264_v36 = vshll.u32 %v858_v50, %v910_v30  ;;  %v145_v37 = vmul.u32 %v141_v18, %v139_v13  ;;  %v164_v41 = vmul.u32 %v162_v19, %v138_v63 }
  0xb0   :  { %v146_v38 = vshll.u32 %v143_v24, 16  ;;  %v167_v42 = vmul.u32 %v163_v23, %v139_v13  ;;  %v147_v43 = vshrl.u32 %v143_v24, 16  ;;  %v148_v44 = vshll.u32 %v144_v25, 16 }
  0xb1   :  { %v168_v45 = vshll.u32 %v165_v29, 16  ;;  %v170_v46 = vshll.u32 %v166_v32, 16  ;;  %v972_v49 = vor.u32 %v262_v27, %v261_v26  ;;  %v265_v51 = vshrl.u32 %v859_v55, %v922_v40 }
  0xb2   :  { %vm150_vm8 = vc.u32 %v142_v28, %v146_v38  ;;  %v152_v47 = vadd.s32 %v146_v38, %v142_v28  ;;  %v860_v52 = vmov 0   ;;  %v267_v50 = vshll.u32 %v859_v55, %v910_v30 }
  0xb3   :  { %v151_v53 = vsel %vm150_vm8, 1, %v860_v52  ;;  %vm172_vm9 = vc.u32 %v164_v41, %v168_v45  ;;  %v174_v54 = vadd.s32 %v168_v45, %v164_v41  ;;  %v978_v58 = vor.u32 %v265_v51, %v264_v36 }
  0xb4   :  { %v153_v56 = vadd.s32 %v151_v53, %v145_v37  ;;  %vm154_vm10 = vc.u32 %v152_v47, %v148_v44  ;;  %v173_v57 = vsel %vm172_vm9, 1, %v860_v52  ;;  %v149_v59 = vshrl.u32 %v144_v25, 16 }
  0xb5   :  { %v155_v60 = vsel %vm154_vm10, 1, %v860_v52  ;;  %v175_v61 = vadd.s32 %v173_v57, %v167_v42  ;;  %vm176_vm11 = vc.u32 %v174_v54, %v170_v46  ;;  %v268_v1 = vshrl.u32 %v854_v35, %v922_v40 }
  0xb6   :  { %v157_v62 = vadd.s32 %v155_v60, %v153_v56  ;;  %v177_v63 = vsel %vm176_vm11, 1, %v860_v52  ;;  %vm276_vm12 = vcmp.lt.s32.totalorder %v919_v39, 1  ;;  %v169_v30 = vshrl.u32 %v165_v29, 16 }
  0xb7   :  { %v179_v55 = vadd.s32 %v177_v63, %v175_v61  ;;  %vm277_vm13 = vcmp.lt.s32.totalorder %v919_v39, 2  ;;  %vm278_vm14 = vcmp.lt.s32.totalorder %v919_v39, 3  ;;  %v269_v3 = vor.u32 %v268_v1, %v267_v50 }
  0xb8   :  { %v158_v2 = vadd.s32 %v157_v62, %v147_v43  ;;  %v284_v4 = vsel %vm276_vm12, %v972_v49, %v978_v58  ;;  %v290_v5 = vsel %vm278_vm14, %v937_v0, %v289_v20  ;;  %v171_v35 = vshrl.u32 %v166_v32, 16 }
  0xb9   :  { %v180_v6 = vadd.s32 %v179_v55, %v169_v30  ;;  %v996_v8 = vadd.s32 %v174_v54, %v170_v46  ;;  %v286_v9 = vsel %vm278_vm14, %v269_v3, %v285_v14  ;;  %v288_v10 = vsel %vm276_vm12, %v978_v58, %v269_v3 }
  0xba   :  { %v994_v7 = vadd.s32 %v158_v2, %v149_v59  ;;  %v128_v13 = vsel %vm122_vm6, %v125_v21, %v127_v22  ;;  %v287_v0 = vsel %vm277_vm13, %v284_v4, %v286_v9  ;;  %v291_v18 = vsel %vm277_vm13, %v288_v10, %v290_v5 }
  0xbb   :  { %v181_v17 = vadd.s32 %v180_v6, %v171_v35  ;;  %v293_v19 = vand.u32 65535, %v916_v34  ;;  %v294_v14 = vshrl.u32 %v916_v34, 16  ;;  %v295_v20 = vand.u32 65535, %v291_v18 }
  0xbc   :  { %vm184_vm15 = vc.u32 %v994_v7, %v996_v8  ;;  %v296_v24 = vshrl.u32 %v291_v18, 16  ;;  %v317_v25 = vand.u32 65535, %v287_v0  ;;  %v318_v31 = vshrl.u32 %v287_v0, 16 }
  0xbd   :  { %v185_v23 = vadd.s32 1, %v181_v17  ;;  %v182_v21 = vmul.u32 %v914_v33, %v128_v13  ;;  %v299_v27 = vmul.u32 %v295_v20, %v294_v14  ;;  %v297_v32 = vmul.u32 %v295_v20, %v293_v19 }
  0xbe   :  { %v298_v26 = vmul.u32 %v296_v24, %v293_v19  ;;  %v320_v29 = vmul.u32 %v318_v31, %v293_v19  ;;  %v321_v37 = vmul.u32 %v317_v25, %v294_v14  ;;  %v300_v41 = vmul.u32 %v296_v24, %v294_v14 }
  0xbf   :  { %v186_v22 = vsel %vm184_vm15, %v185_v23, %v181_v17  ;;  %v319_v42 = vmul.u32 %v317_v25, %v293_v19  ;;  %v303_v44 = vshll.u32 %v299_v27, 16  ;;  %v322_v46 = vmul.u32 %v318_v31, %v294_v14 }
  0xc0   :  { %v187_v28 = vadd.s32 %v186_v22, %v182_v21  ;;  %v301_v36 = vshll.u32 %v298_v26, 16  ;;  %v323_v43 = vshll.u32 %v320_v29, 16  ;;  %v325_v54 = vshll.u32 %v321_v37, 16 }
  0xc1   :  { %v260_v57 = vshrl.u32 %v857_v48, %v922_v40  ;;  %v281_v61 = vsel %vm279_vm4, %v269_v3, 2102212464  ;;  %v302_v62 = vshrl.u32 %v298_v26, 16  ;;  %v304_v55 = vshrl.u32 %v299_v27, 16 }
  0xc2   :  { %v188_v38 = vadd.s32 536870912, %v187_v28  ;;  %vm305_vm0 = vc.u32 %v297_v32, %v301_v36  ;;  %v307_v45 = vadd.s32 %v301_v36, %v297_v32  ;;  %vm327_vm1 = vc.u32 %v319_v42, %v323_v43 }
  0xc3   :  { %v306_v33 = vsel %vm305_vm0, 1, %v860_v52  ;;  %v329_v51 = vadd.s32 %v323_v43, %v319_v42  ;;  %v328_v50 = vsel %vm327_vm1, 1, %v860_v52  ;;  %v324_v4 = vshrl.u32 %v320_v29, 16 }
  0xc4   :  { %v1014_v47 = vshrl.u32 %v188_v38, 30  ;;  %v308_v53 = vadd.s32 %v306_v33, %v300_v41  ;;  %vm309_vm2 = vc.u32 %v307_v45, %v303_v44  ;;  %v330_v60 = vadd.s32 %v328_v50, %v322_v46 }
  0xc5   :  { %v310_v59 = vsel %vm309_vm2, 1, %v860_v52  ;;  %vm331_vm3 = vc.u32 %v329_v51, %v325_v54  ;;  %v280_v40 = vsel %vm276_vm12, %v260_v57, %v972_v49  ;;  %v282_v48 = vsel %vm278_vm14, %v978_v58, %v281_v61 }
  0xc6   :  { %v190_v56 = vshll.u32 %v1014_v47, 30  ;;  %v312_v63 = vadd.s32 %v310_v59, %v308_v53  ;;  %v332_v30 = vsel %vm331_vm3, 1, %v860_v52  ;;  %v326_v6 = vshrl.u32 %v321_v37, 16 }
  0xc7   :  { %v334_v5 = vadd.s32 %v332_v30, %v330_v60  ;;  %v333_v13 = vadd.s32 %v329_v51, %v325_v54  ;;  %v283_v17 = vsel %vm277_vm13, %v280_v40, %v282_v48  ;;  %v183_v58 = vadd.s32 %v996_v8, %v994_v7 }
  0xc8   :  { %v191_v1 = vsub.s32 %v187_v28, %v190_v56  ;;  %v313_v2 = vadd.s32 %v312_v63, %v302_v62  ;;  %v337_v14 = vmul.u32 %v916_v34, %v283_v17  ;;  %vm91_vm8 = vcmp.lt.s32.totalorder %v898_v11, 0 }
  0xc9   :  { %v335_v9 = vadd.s32 %v334_v5, %v324_v4  ;;  %v213_v43 = vsub.s32 4, %v1014_v47  ;;  %vm90_vm9 = vcmp.le.f32.partialorder %v89_v15, 0.7853982  ;;  %vm246_vm11 = vcmp.lt.s32.totalorder %v900_v12, 0 }
  0xca   :  { %vm192_vm5 = vcmp.lt.s32.totalorder %v191_v1, 0  ;;  %v193_v35 = vsub.s32 0, %v191_v1  ;;  %v314_v3 = vadd.s32 %v313_v2, %v304_v55  ;;  %vm1048_vm14 = vcmp.le.f32.partialorder %v244_v16, 0.7853982 }
  0xcb   :  { %v336_v0 = vadd.s32 %v335_v9, %v326_v6  ;;  %v214_v51 = vsel %vm91_vm8, %v213_v43, %v1014_v47  ;;  %vm232_vm3 = vweird.f32 %v898_v11 }
  0xcc   :  { %v194_v10 = vsel %vm192_vm5, %v193_v35, %v191_v1  ;;  %vm339_vm4 = vc.u32 %v314_v3, %v333_v13  ;;  %v338_v56 = vadd.s32 %v333_v13, %v314_v3  ;;  %v216_v60 = vsel %vm90_vm9, 0, %v214_v51 }
  0xcd   :  { %v195_v52 = vclz %v194_v10  ;;  %v340_v19 = vadd.s32 1, %v336_v0  ;;  %v233_v2 = vadd.s32 3, %v216_v60  ;;  %v543_v3 = vand.u32 3, %v216_v60 }
  0xcf   :  { %v743_v18 = vadd.s32 4294967294, %v195_v52  ;;  %v341_v49 = vsel %vm339_vm4, %v340_v19, %v336_v0  ;;  %v234_v9 = vand.u32 3, %v233_v2  ;;  %vm544_vm13 = vcmp.lt.s32.totalorder %v543_v3, 2 }
  0xd0   :  { %v342_v23 = vadd.s32 %v341_v49, %v337_v14  ;;  %vm545_vm15 = vcmp.eq.s32.totalorder %v543_v3, 0  ;;  %vm548_vm2 = vcmp.eq.s32.totalorder %v543_v3, 2 }
  0xd1   :  { %vm744_vm6 = vcmp.lt.s32.totalorder %v743_v18, 0  ;;  %vm239_vm12 = vcmp.eq.s32.totalorder %v234_v9, 2  ;;  %vm235_vm0 = vcmp.lt.s32.totalorder %v234_v9, 2  ;;  %vm236_vm1 = vcmp.eq.s32.totalorder %v234_v9, 0 }
  0xd2   :  { %v198_v20 = vsel %vm744_vm6, 0, %v743_v18  ;;  %v343_v31 = vadd.s32 536870912, %v342_v23 }
  0xd3   :  { %v199_v24 = vsub.s32 32, %v198_v20  ;;  %v203_v25 = vsub.s32 4294967266, %v198_v20  ;;  %v200_v21 = vshll.u32 %v191_v1, %v198_v20 }
  0xd4   :  { %v1036_v26 = vshrl.u32 %v343_v31, 30 }
  0xd5   :  { %v201_v22 = vshrl.u32 %v183_v58, %v199_v24  ;;  %v204_v39 = vadd.s32 127, %v203_v25 }
  0xd6   :  { %v345_v29 = vshll.u32 %v1036_v26, 30  ;;  %v368_v58 = vsub.s32 4, %v1036_v26 }
  0xd7   :  { %v202_v27 = vor.u32 %v201_v22, %v200_v21  ;;  %v205_v28 = vshll.u32 %v204_v39, 23 }
  0xd8   :  { %v346_v32 = vsub.s32 %v342_v23, %v345_v29 }
  0xd9   :  { %v206_v34 = vor.u32 4788187, %v205_v28  ;;  %v209_v37 = vcvt.s32.f32 %v202_v27 }
  0xda   :  { %vm347_vm7 = vcmp.lt.s32.totalorder %v346_v32, 0  ;;  %v348_v38 = vsub.s32 0, %v346_v32 }
  0xdb   :  { %v207_v36 = vand.u32 2147483647, %v206_v34  ;;  %v369_v34 = vsel %vm246_vm11, %v368_v58, %v1036_v26 }
  0xdc   :  { %v349_v7 = vsel %vm347_vm7, %v348_v38, %v346_v32 }
  0xdd   :  { %v210_v41 = vmul.f32 %v209_v37, %v207_v36  ;;  %v350_v42 = vclz %v349_v7  ;;  %v371_v37 = vsel %vm1048_vm14, 0, %v369_v34 }
  0xde   :  { %v697_v51 = vand.u32 3, %v371_v37 }
  0xdf   :  { %v211_v8 = vxor.u32 2147483648, %v210_v41  ;;  %v746_v45 = vadd.s32 4294967294, %v350_v42 }
  0xe0   :  { %vm698_vm6 = vcmp.lt.s32.totalorder %v697_v51, 2  ;;  %vm699_vm7 = vcmp.eq.s32.totalorder %v697_v51, 0 }
  0xe1   :  { %v212_v44 = vsel %vm91_vm8, %v211_v8, %v210_v41  ;;  %vm747_vm10 = vcmp.lt.s32.totalorder %v746_v45, 0  ;;  %v388_v8 = vadd.s32 3, %v371_v37  ;;  %vm702_vm8 = vcmp.eq.s32.totalorder %v697_v51, 2 }
  0xe2   :  { %v215_v46 = vsel %vm90_vm9, %v898_v11, %v212_v44  ;;  %v353_v53 = vsel %vm747_vm10, 0, %v746_v45  ;;  %vm387_vm10 = vweird.f32 %v900_v12 }
  0xe3   :  { %v217_v33 = vmul.f32 %v215_v46, %v215_v46  ;;  %v354_v57 = vsub.s32 32, %v353_v53  ;;  %v358_v59 = vsub.s32 4294967266, %v353_v53  ;;  %v355_v1 = vshll.u32 %v346_v32, %v353_v53 }
  0xe5   :  { %v218_v54 = vmul.f32 -0.001358992, %v217_v33  ;;  %v225_v50 = vmul.f32 -0.00019511016, %v217_v33  ;;  %v356_v63 = vshrl.u32 %v338_v56, %v354_v57  ;;  %v359_v15 = vadd.s32 127, %v358_v59 }
  0xe7   :  { %v219_v61 = vadd.f32 0.041655596, %v218_v54  ;;  %v226_v62 = vadd.f32 0.008332121, %v225_v50  ;;  %v357_v4 = vor.u32 %v356_v63, %v355_v1  ;;  %v360_v5 = vshll.u32 %v359_v15, 23 }
  0xe9   :  { %v220_v30 = vmul.f32 %v219_v61, %v217_v33  ;;  %v227_v55 = vmul.f32 %v226_v62, %v217_v33  ;;  %v361_v47 = vor.u32 4788187, %v360_v5  ;;  %v364_v13 = vcvt.s32.f32 %v357_v4 }
  0xeb   :  { %v221_v35 = vadd.f32 -0.4999988, %v220_v30  ;;  %v228_v40 = vadd.f32 -0.16666654, %v227_v55  ;;  %v362_v10 = vand.u32 2147483647, %v361_v47 }
  0xed   :  { %v222_v48 = vmul.f32 %v221_v35, %v217_v33  ;;  %v229_v6 = vmul.f32 %v228_v40, %v217_v33  ;;  %v365_v0 = vmul.f32 %v364_v13, %v362_v10 }
  0xef   :  { %v223_v52 = vadd.f32 1.0, %v222_v48  ;;  %v230_v17 = vadd.f32 1.0, %v229_v6  ;;  %v366_v49 = vxor.u32 2147483648, %v365_v0 }
  0xf1   :  { %v231_v18 = vmul.f32 %v230_v17, %v215_v46  ;;  %v240_v19 = vxor.u32 2147483648, %v223_v52  ;;  %v367_v24 = vsel %vm246_vm11, %v366_v49, %v365_v0  ;;  %v389_v46 = vand.u32 3, %v388_v8 }
  0xf2   :  { %v370_v16 = vsel %vm1048_vm14, %v900_v12, %v367_v24  ;;  %vm715_vm11 = vcmask 523264  }
  0xf3   :  { %v237_v20 = vxor.u32 2147483648, %v231_v18  ;;  %v241_v23 = vsel %vm239_vm12, %v240_v19, %v231_v18  ;;  %v550_v31 = vsel %vm548_vm2, %v240_v19, %v231_v18  ;;  %v372_v27 = vmul.f32 %v370_v16, %v370_v16 }
  0xf4   :  { %vm394_vm5 = vcmp.eq.s32.totalorder %v389_v46, 2  ;;  %vm391_vm4 = vcmp.eq.s32.totalorder %v389_v46, 0  ;;  %vm390_vm9 = vcmp.lt.s32.totalorder %v389_v46, 2 }
  0xf5   :  { %v547_v25 = vsel %vm545_vm15, %v223_v52, %v237_v20  ;;  %v238_v21 = vsel %vm236_vm1, %v223_v52, %v237_v20  ;;  %v373_v32 = vmul.f32 -0.001358992, %v372_v27  ;;  %v380_v36 = vmul.f32 -0.00019511016, %v372_v27 }
  0xf6   :  { %v551_v22 = vsel %vm544_vm13, %v547_v25, %v550_v31  ;;  %v242_v39 = vsel %vm235_vm0, %v238_v21, %v241_v23 }
  0xf7   :  { %v552_v28 = vsel %vm232_vm3, nan, %v551_v22  ;;  %v243_v29 = vsel %vm232_vm3, nan, %v242_v39  ;;  %v374_v38 = vadd.f32 0.041655596, %v373_v32  ;;  %v381_v11 = vadd.f32 0.008332121, %v380_v36 }
  0xf8   :  { %709 = vrot.lane.b32.xlu0 %v552_v28, %s861_s2 }
  0xf9   :  { %v375_v41 = vmul.f32 %v374_v38, %v372_v27  ;;  %v382_v7 = vmul.f32 %v381_v11, %v372_v27 }
  0xfb   :  { %v376_v42 = vadd.f32 -0.4999988, %v375_v41  ;;  %v383_v43 = vadd.f32 -0.16666654, %v382_v7 }
  0xfd   :  { %v377_v44 = vmul.f32 %v376_v42, %v372_v27  ;;  %v384_v45 = vmul.f32 %v383_v43, %v372_v27 }
  0xff   :  { %v378_v33 = vadd.f32 1.0, %v377_v44  ;;  %v385_v26 = vadd.f32 1.0, %v384_v45 }
 0x101   :  { %v386_v53 = vmul.f32 %v385_v26, %v370_v16  ;;  %v395_v54 = vxor.u32 2147483648, %v378_v33 }
 0x103   :  { %v392_v50 = vxor.u32 2147483648, %v386_v53  ;;  %v396_v56 = vsel %vm394_vm5, %v395_v54, %v386_v53  ;;  %v704_v60 = vsel %vm702_vm8, %v395_v54, %v386_v53 }
 0x105   :  { %v393_v57 = vsel %vm391_vm4, %v378_v33, %v392_v50  ;;  %v701_v59 = vsel %vm699_vm7, %v378_v33, %v392_v50 }
 0x106   :  { %v397_v61 = vsel %vm390_vm9, %v393_v57, %v396_v56  ;;  %v705_v62 = vsel %vm698_vm6, %v701_v59, %v704_v60 }
 0x107   :  { %v398_v63 = vsel %vm387_vm10, nan, %v397_v61  ;;  %v706_v1 = vsel %vm387_vm10, nan, %v705_v62 }
 0x108   :  { %711 = vrot.lane.b32.xlu0 %v706_v1, %s861_s2 }
 0x16a   :  { %v710_v15 = vpop.permute.xlu0 %709 }
 0x16b   :  { %v716_v30 = vsel %vm715_vm11, %v243_v29, %v710_v15 }
 0x16c   :  { %718 = vst [vmem:[#allocation7] sm:$0xff] %v716_v30 }
 0x17a   :  { %v712_v55 = vpop.permute.xlu0 %711 }
 0x17b   :  { %v717_v12 = vsel %vm715_vm11, %v398_v63, %v712_v55 }
 0x17c   :  { %719 = vst [vmem:[#allocation7 + $0x8] sm:$0xff] %v717_v12 }
 0x17d   :  { %732 = dma.vmem_to_hbm [thread:$0]  %s725_s25, 256, %s727_s28, [#allocation4], %s851_s20, %s851_s20, %s852_s21  }
 0x17e   :  { %848 = dma.done.wait [#allocation4], 256  }
 0x17f   :  { %849 = vsyncadd [#allocation4], 4294967040 }
 0x180   :  { %737 = vsyncpa [#allocation3], 1 }
 0x181   :  { %738 = vsyncpa [#allocation6], 1 }
 0x182   :  { %739 = vsyncpa [#allocation4], 1 }

// kernel: tpu_custom_call.1
= control target key start
LH: loop header
LB: loop body
LE: loop exit
PB: predicated region body
PF: predicated region fallthrough
CT: control target
= control target key end

     0   :  { %8 = vsyncpa [#allocation3], 0  ;;  %s1074_s0 = inlined_call_operand.hbm [shape: f32[16,32], index: 0, kind: input, shape index: {}]   ;;  %s1075_s1 = inlined_call_operand.hbm [shape: f32[32,64], index: 1, kind: input, shape index: {}]   ;;  %s1076_s2 = inlined_call_operand.vmem [shape: f32[1,64], index: 2, kind: input, shape index: {}]   ;;  %s1077_s3 = inlined_call_operand.hbm [shape: f32[16,128], index: 3, kind: output, shape index: {}]  }
   0x1   :  { %9 = vsyncpa [#allocation6], 0 }
   0x2   :  { %10 = vsyncpa [#allocation4], 0  ;;  %s15_s14 = sshll.u32 %s1074_s0, 4  ;;  %s850_s15 = smov [#allocation2]   ;;  %s16_s14 = int_to_ptr.hbm [resolvable:$true] %s15_s14 }
   0x3   :  { %s17_s16 = sshll.u32 %s850_s15, 4  ;;  %s28_s19 = sshll.u32 %s1075_s1, 4  ;;  %s18_s16 = int_to_ptr.vmem [resolvable:$true] %s17_s16  ;;  %s29_s19 = int_to_ptr.hbm [resolvable:$true] %s28_s19 }
   0x4   :  { %s851_s20 = smov 128   ;;  %s852_s21 = smov 8  }
   0x5   :  { %23 = dma.hbm_to_vmem [thread:$0]  %s16_s14, 256, %s18_s16, [#allocation3], %s851_s20, %s851_s20, %s852_s21  }
   0x6   :  { %s853_s22 = smov [#allocation5]  }
   0x7   :  { %s30_s23 = sshll.u32 %s853_s22, 4  ;;  %s31_s23 = int_to_ptr.vmem [resolvable:$true] %s30_s23 }
   0x8   :  { %36 = dma.hbm_to_vmem [thread:$0]  %s29_s19, 512, %s31_s23, [#allocation6], %s851_s20, %s851_s20, %s852_s21  }
   0x9   :  { %844 = dma.done.wait [#allocation3], 256  }
   0xa   :  { %845 = vsyncadd [#allocation3], 4294967040 }
   0xb   :  { %846 = dma.done.wait [#allocation6], 512  }
   0xc   :  { %847 = vsyncadd [#allocation6], 4294966784  ;;  %v52_v0 = vld [vmem:[#allocation5 + $0x18] sm:$0xff]  ;;  %v51_v1 = vld [vmem:[#allocation5 + $0x10] sm:$0xff]  ;;  %vm57_vm0 = vcmask 261120   ;;  %s862_s24 = smov [#allocation7]  }
   0xd   :  { %76 = vmatpush.msra.mxu0 %v52_v0  ;;  %754 = vmatpush.msra.mxu1 %v52_v0  ;;  %v50_v2 = vld [vmem:[#allocation5 + $0x8] sm:$0xff]  ;;  %v49_v3 = vld [vmem:[#allocation5] sm:$0xff]  ;;  %v47_v4 = vld [vmem:[#allocation2] sm:$0xff]  ;;  %v854_v35 = vmov 2102212464   ;;  %s724_s25 = sshll.u32 %s862_s24, 4  ;;  %s725_s25 = int_to_ptr.vmem [resolvable:$true] %s724_s25 }
   0xe   :  { %v48_v5 = vld [vmem:[#allocation2 + $0x8] sm:$0xff]  ;;  %v771_v6 = vld [vmem:[%s1076_s2] ss:$0 sm:$0xff]  ;;  %v855_v37 = vmov 920167782   ;;  %s861_s2 = smov 64  }
   0xf   :  { %77 = vmatpush.msra.mxu0 %v51_v1  ;;  %755 = vmatpush.msra.mxu1 %v51_v1  ;;  %v856_v42 = vmov 1326507024   ;;  %v857_v48 = vmov 683565275   ;;  %v858_v50 = vmov 2475754826  }
  0x10   :  { %v859_v55 = vmov 2131351028   ;;  %s726_s28 = sshll.u32 %s1077_s3, 4  ;;  %s727_s28 = int_to_ptr.hbm [resolvable:$true] %s726_s28 }
  0x11   :  { %78 = vmatpush.msra.mxu0 %v50_v2  ;;  %756 = vmatpush.msra.mxu1 %v50_v2 }
  0x13   :  { %79 = vmatpush.msra.mxu0 %v49_v3  ;;  %757 = vmatpush.msra.mxu1 %v49_v3 }
  0x14   :  { %740 = vmatmul.msk.f32.vlgmr.msra.gmra.mxu0 %vm57_vm0, %v47_v4  ;;  %741 = vmatmul.msk.f32.vlgmr.msra.gmra.mxu1 %vm57_vm0, %v48_v5 }
  0x91   :  { %v81_v7 = vpop.f32.mrf.mxu0  ;;  %v84_v8 = vpop.f32.mrf.mxu1 }
  0x92   :  { %v82_v9 = vadd.f32 %v771_v6, %v81_v7  ;;  %v85_v10 = vadd.f32 %v771_v6, %v84_v8 }
  0x94   :  { %v898_v11 = vmul.f32 30.0, %v82_v9  ;;  %v900_v12 = vmul.f32 30.0, %v85_v10 }
  0x96   :  { %v92_v13 = vand.u32 2139095040, %v898_v11  ;;  %v247_v14 = vand.u32 2139095040, %v900_v12  ;;  %v89_v15 = vand.u32 2147483647, %v898_v11  ;;  %v244_v16 = vand.u32 2147483647, %v900_v12 }
  0x98   :  { %v93_v17 = vshrl.u32 %v92_v13, 23  ;;  %v248_v18 = vshrl.u32 %v247_v14, 23  ;;  %v96_v21 = vand.u32 8388607, %v89_v15  ;;  %v251_v22 = vand.u32 8388607, %v244_v16 }
  0x9a   :  { %v742_v19 = vadd.s32 4294967169, %v93_v17  ;;  %v745_v20 = vadd.s32 4294967169, %v248_v18  ;;  %v97_v25 = vor.u32 8388608, %v96_v21  ;;  %v252_v26 = vor.u32 8388608, %v251_v22 }
  0x9c   :  { %v99_v23 = vadd.s32 1, %v742_v19  ;;  %v254_v24 = vadd.s32 1, %v745_v20  ;;  %v914_v33 = vshll.u32 %v97_v25, 8  ;;  %v916_v34 = vshll.u32 %v252_v26, 8 }
  0x9e   :  { %vm100_vm1 = vcmp.gt.s32.totalorder %v99_v23, 0  ;;  %vm255_vm2 = vcmp.gt.s32.totalorder %v254_v24, 0  ;;  %v138_v63 = vand.u32 65535, %v914_v33  ;;  %v139_v13 = vshrl.u32 %v914_v33, 16 }
  0x9f   :  { %v101_v27 = vsel %vm100_vm1, %v99_v23, 0  ;;  %v256_v28 = vsel %vm255_vm2, %v254_v24, 0 }
  0xa0   :  { %v103_v29 = vand.u32 31, %v101_v27  ;;  %v910_v30 = vand.u32 31, %v256_v28  ;;  %v912_v31 = vshrl.u32 %v101_v27, 5  ;;  %v919_v39 = vshrl.u32 %v256_v28, 5 }
  0xa2   :  { %v104_v32 = vsub.s32 32, %v103_v29  ;;  %v115_v36 = vshll.u32 %v854_v35, %v103_v29  ;;  %v118_v38 = vshll.u32 %v855_v37, %v103_v29  ;;  %v922_v40 = vsub.s32 32, %v910_v30 }
  0xa3   :  { %v270_v44 = vshll.u32 %v854_v35, %v910_v30  ;;  %v273_v45 = vshll.u32 %v855_v37, %v910_v30  ;;  %v106_v49 = vshll.u32 %v857_v48, %v103_v29  ;;  %v109_v54 = vshll.u32 %v858_v50, %v103_v29 }
  0xa4   :  { %v116_v41 = vshrl.u32 %v855_v37, %v104_v32  ;;  %v119_v43 = vshrl.u32 %v856_v42, %v104_v32  ;;  %v271_v46 = vshrl.u32 %v855_v37, %v922_v40  ;;  %v274_v47 = vshrl.u32 %v856_v42, %v922_v40 }
  0xa5   :  { %v107_v51 = vshrl.u32 %v858_v50, %v104_v32  ;;  %v110_v56 = vshrl.u32 %v859_v55, %v104_v32  ;;  %vm124_vm3 = vcmp.lt.s32.totalorder %v912_v31, 4  ;;  %v112_v58 = vshll.u32 %v859_v55, %v103_v29 }
  0xa6   :  { %v117_v52 = vor.u32 %v116_v41, %v115_v36  ;;  %v120_v53 = vor.u32 %v119_v43, %v118_v38  ;;  %v113_v59 = vshrl.u32 %v854_v35, %v104_v32  ;;  %v937_v0 = vor.u32 %v271_v46, %v270_v44 }
  0xa7   :  { %v108_v57 = vor.u32 %v107_v51, %v106_v49  ;;  %v111_v62 = vor.u32 %v110_v56, %v109_v54  ;;  %vm279_vm4 = vcmp.lt.s32.totalorder %v919_v39, 4  ;;  %vm121_vm5 = vcmp.lt.s32.totalorder %v912_v31, 1 }
  0xa8   :  { %v130_v60 = vsel %vm124_vm3, %v117_v52, 920167782  ;;  %v134_v61 = vsel %vm124_vm3, %v120_v53, 1326507024  ;;  %v114_v1 = vor.u32 %v113_v59, %v112_v58  ;;  %v275_v2 = vor.u32 %v274_v47, %v273_v45 }
  0xa9   :  { %vm122_vm6 = vcmp.lt.s32.totalorder %v912_v31, 2  ;;  %vm123_vm7 = vcmp.lt.s32.totalorder %v912_v31, 3  ;;  %v129_v3 = vsel %vm121_vm5, %v108_v57, %v111_v62  ;;  %v105_v8 = vshrl.u32 %v857_v48, %v104_v32 }
  0xaa   :  { %v126_v4 = vsel %vm124_vm3, %v114_v1, 2102212464  ;;  %v131_v5 = vsel %vm123_vm7, %v114_v1, %v130_v60  ;;  %v133_v6 = vsel %vm121_vm5, %v111_v62, %v114_v1  ;;  %v135_v7 = vsel %vm123_vm7, %v117_v52, %v134_v61 }
  0xab   :  { %v132_v9 = vsel %vm122_vm6, %v129_v3, %v131_v5  ;;  %v136_v10 = vsel %vm122_vm6, %v133_v6, %v135_v7  ;;  %v285_v14 = vsel %vm279_vm4, %v937_v0, 920167782  ;;  %v289_v20 = vsel %vm279_vm4, %v275_v2, 1326507024 }
  0xac   :  { %v140_v17 = vand.u32 65535, %v136_v10  ;;  %v141_v18 = vshrl.u32 %v136_v10, 16  ;;  %v162_v19 = vand.u32 65535, %v132_v9  ;;  %v125_v21 = vsel %vm121_vm5, %v105_v8, %v108_v57 }
  0xad   :  { %v127_v22 = vsel %vm123_vm7, %v111_v62, %v126_v4  ;;  %v163_v23 = vshrl.u32 %v132_v9, 16  ;;  %v261_v26 = vshll.u32 %v857_v48, %v910_v30  ;;  %v262_v27 = vshrl.u32 %v858_v50, %v922_v40 }
  0xae   :  { %v143_v24 = vmul.u32 %v141_v18, %v138_v63  ;;  %v144_v25 = vmul.u32 %v140_v17, %v139_v13  ;;  %v142_v28 = vmul.u32 %v140_v17, %v138_v63  ;;  %v166_v32 = vmul.u32 %v162_v19, %v139_v13 }
  0xaf   :  { %v165_v29 = vmul.u32 %v163_v23, %v138_v63  ;;  %v264_v36 = vshll.u32 %v858_v50, %v910_v30  ;;  %v145_v37 = vmul.u32 %v141_v18, %v139_v13  ;;  %v164_v41 = vmul.u32 %v162_v19, %v138_v63 }
  0xb0   :  { %v146_v38 = vshll.u32 %v143_v24, 16  ;;  %v167_v42 = vmul.u32 %v163_v23, %v139_v13  ;;  %v147_v43 = vshrl.u32 %v143_v24, 16  ;;  %v148_v44 = vshll.u32 %v144_v25, 16 }
  0xb1   :  { %v168_v45 = vshll.u32 %v165_v29, 16  ;;  %v170_v46 = vshll.u32 %v166_v32, 16  ;;  %v972_v49 = vor.u32 %v262_v27, %v261_v26  ;;  %v265_v51 = vshrl.u32 %v859_v55, %v922_v40 }
  0xb2   :  { %vm150_vm8 = vc.u32 %v142_v28, %v146_v38  ;;  %v152_v47 = vadd.s32 %v146_v38, %v142_v28  ;;  %v860_v52 = vmov 0   ;;  %v267_v50 = vshll.u32 %v859_v55, %v910_v30 }
  0xb3   :  { %v151_v53 = vsel %vm150_vm8, 1, %v860_v52  ;;  %vm172_vm9 = vc.u32 %v164_v41, %v168_v45  ;;  %v174_v54 = vadd.s32 %v168_v45, %v164_v41  ;;  %v978_v58 = vor.u32 %v265_v51, %v264_v36 }
  0xb4   :  { %v153_v56 = vadd.s32 %v151_v53, %v145_v37  ;;  %vm154_vm10 = vc.u32 %v152_v47, %v148_v44  ;;  %v173_v57 = vsel %vm172_vm9, 1, %v860_v52  ;;  %v149_v59 = vshrl.u32 %v144_v25, 16 }
  0xb5   :  { %v155_v60 = vsel %vm154_vm10, 1, %v860_v52  ;;  %v175_v61 = vadd.s32 %v173_v57, %v167_v42  ;;  %vm176_vm11 = vc.u32 %v174_v54, %v170_v46  ;;  %v268_v1 = vshrl.u32 %v854_v35, %v922_v40 }
  0xb6   :  { %v157_v62 = vadd.s32 %v155_v60, %v153_v56  ;;  %v177_v63 = vsel %vm176_vm11, 1, %v860_v52  ;;  %vm276_vm12 = vcmp.lt.s32.totalorder %v919_v39, 1  ;;  %v169_v30 = vshrl.u32 %v165_v29, 16 }
  0xb7   :  { %v179_v55 = vadd.s32 %v177_v63, %v175_v61  ;;  %vm277_vm13 = vcmp.lt.s32.totalorder %v919_v39, 2  ;;  %vm278_vm14 = vcmp.lt.s32.totalorder %v919_v39, 3  ;;  %v269_v3 = vor.u32 %v268_v1, %v267_v50 }
  0xb8   :  { %v158_v2 = vadd.s32 %v157_v62, %v147_v43  ;;  %v284_v4 = vsel %vm276_vm12, %v972_v49, %v978_v58  ;;  %v290_v5 = vsel %vm278_vm14, %v937_v0, %v289_v20  ;;  %v171_v35 = vshrl.u32 %v166_v32, 16 }
  0xb9   :  { %v180_v6 = vadd.s32 %v179_v55, %v169_v30  ;;  %v996_v8 = vadd.s32 %v174_v54, %v170_v46  ;;  %v286_v9 = vsel %vm278_vm14, %v269_v3, %v285_v14  ;;  %v288_v10 = vsel %vm276_vm12, %v978_v58, %v269_v3 }
  0xba   :  { %v994_v7 = vadd.s32 %v158_v2, %v149_v59  ;;  %v128_v13 = vsel %vm122_vm6, %v125_v21, %v127_v22  ;;  %v287_v0 = vsel %vm277_vm13, %v284_v4, %v286_v9  ;;  %v291_v18 = vsel %vm277_vm13, %v288_v10, %v290_v5 }
  0xbb   :  { %v181_v17 = vadd.s32 %v180_v6, %v171_v35  ;;  %v293_v19 = vand.u32 65535, %v916_v34  ;;  %v294_v14 = vshrl.u32 %v916_v34, 16  ;;  %v295_v20 = vand.u32 65535, %v291_v18 }
  0xbc   :  { %vm184_vm15 = vc.u32 %v994_v7, %v996_v8  ;;  %v296_v24 = vshrl.u32 %v291_v18, 16  ;;  %v317_v25 = vand.u32 65535, %v287_v0  ;;  %v318_v31 = vshrl.u32 %v287_v0, 16 }
  0xbd   :  { %v185_v23 = vadd.s32 1, %v181_v17  ;;  %v182_v21 = vmul.u32 %v914_v33, %v128_v13  ;;  %v299_v27 = vmul.u32 %v295_v20, %v294_v14  ;;  %v297_v32 = vmul.u32 %v295_v20, %v293_v19 }
  0xbe   :  { %v298_v26 = vmul.u32 %v296_v24, %v293_v19  ;;  %v320_v29 = vmul.u32 %v318_v31, %v293_v19  ;;  %v321_v37 = vmul.u32 %v317_v25, %v294_v14  ;;  %v300_v41 = vmul.u32 %v296_v24, %v294_v14 }
  0xbf   :  { %v186_v22 = vsel %vm184_vm15, %v185_v23, %v181_v17  ;;  %v319_v42 = vmul.u32 %v317_v25, %v293_v19  ;;  %v303_v44 = vshll.u32 %v299_v27, 16  ;;  %v322_v46 = vmul.u32 %v318_v31, %v294_v14 }
  0xc0   :  { %v187_v28 = vadd.s32 %v186_v22, %v182_v21  ;;  %v301_v36 = vshll.u32 %v298_v26, 16  ;;  %v323_v43 = vshll.u32 %v320_v29, 16  ;;  %v325_v54 = vshll.u32 %v321_v37, 16 }
  0xc1   :  { %v260_v57 = vshrl.u32 %v857_v48, %v922_v40  ;;  %v281_v61 = vsel %vm279_vm4, %v269_v3, 2102212464  ;;  %v302_v62 = vshrl.u32 %v298_v26, 16  ;;  %v304_v55 = vshrl.u32 %v299_v27, 16 }
  0xc2   :  { %v188_v38 = vadd.s32 536870912, %v187_v28  ;;  %vm305_vm0 = vc.u32 %v297_v32, %v301_v36  ;;  %v307_v45 = vadd.s32 %v301_v36, %v297_v32  ;;  %vm327_vm1 = vc.u32 %v319_v42, %v323_v43 }
  0xc3   :  { %v306_v33 = vsel %vm305_vm0, 1, %v860_v52  ;;  %v329_v51 = vadd.s32 %v323_v43, %v319_v42  ;;  %v328_v50 = vsel %vm327_vm1, 1, %v860_v52  ;;  %v324_v4 = vshrl.u32 %v320_v29, 16 }
  0xc4   :  { %v1014_v47 = vshrl.u32 %v188_v38, 30  ;;  %v308_v53 = vadd.s32 %v306_v33, %v300_v41  ;;  %vm309_vm2 = vc.u32 %v307_v45, %v303_v44  ;;  %v330_v60 = vadd.s32 %v328_v50, %v322_v46 }
  0xc5   :  { %v310_v59 = vsel %vm309_vm2, 1, %v860_v52  ;;  %vm331_vm3 = vc.u32 %v329_v51, %v325_v54  ;;  %v280_v40 = vsel %vm276_vm12, %v260_v57, %v972_v49  ;;  %v282_v48 = vsel %vm278_vm14, %v978_v58, %v281_v61 }
  0xc6   :  { %v190_v56 = vshll.u32 %v1014_v47, 30  ;;  %v312_v63 = vadd.s32 %v310_v59, %v308_v53  ;;  %v332_v30 = vsel %vm331_vm3, 1, %v860_v52  ;;  %v326_v6 = vshrl.u32 %v321_v37, 16 }
  0xc7   :  { %v334_v5 = vadd.s32 %v332_v30, %v330_v60  ;;  %v333_v13 = vadd.s32 %v329_v51, %v325_v54  ;;  %v283_v17 = vsel %vm277_vm13, %v280_v40, %v282_v48  ;;  %v183_v58 = vadd.s32 %v996_v8, %v994_v7 }
  0xc8   :  { %v191_v1 = vsub.s32 %v187_v28, %v190_v56  ;;  %v313_v2 = vadd.s32 %v312_v63, %v302_v62  ;;  %v337_v14 = vmul.u32 %v916_v34, %v283_v17  ;;  %vm91_vm8 = vcmp.lt.s32.totalorder %v898_v11, 0 }
  0xc9   :  { %v335_v9 = vadd.s32 %v334_v5, %v324_v4  ;;  %v213_v43 = vsub.s32 4, %v1014_v47  ;;  %vm90_vm9 = vcmp.le.f32.partialorder %v89_v15, 0.7853982  ;;  %vm246_vm11 = vcmp.lt.s32.totalorder %v900_v12, 0 }
  0xca   :  { %vm192_vm5 = vcmp.lt.s32.totalorder %v191_v1, 0  ;;  %v193_v35 = vsub.s32 0, %v191_v1  ;;  %v314_v3 = vadd.s32 %v313_v2, %v304_v55  ;;  %vm1048_vm14 = vcmp.le.f32.partialorder %v244_v16, 0.7853982 }
  0xcb   :  { %v336_v0 = vadd.s32 %v335_v9, %v326_v6  ;;  %v214_v51 = vsel %vm91_vm8, %v213_v43, %v1014_v47  ;;  %vm232_vm3 = vweird.f32 %v898_v11 }
  0xcc   :  { %v194_v10 = vsel %vm192_vm5, %v193_v35, %v191_v1  ;;  %vm339_vm4 = vc.u32 %v314_v3, %v333_v13  ;;  %v338_v56 = vadd.s32 %v333_v13, %v314_v3  ;;  %v216_v60 = vsel %vm90_vm9, 0, %v214_v51 }
  0xcd   :  { %v195_v52 = vclz %v194_v10  ;;  %v340_v19 = vadd.s32 1, %v336_v0  ;;  %v233_v2 = vadd.s32 3, %v216_v60  ;;  %v543_v3 = vand.u32 3, %v216_v60 }
  0xcf   :  { %v743_v18 = vadd.s32 4294967294, %v195_v52  ;;  %v341_v49 = vsel %vm339_vm4, %v340_v19, %v336_v0  ;;  %v234_v9 = vand.u32 3, %v233_v2  ;;  %vm544_vm13 = vcmp.lt.s32.totalorder %v543_v3, 2 }
  0xd0   :  { %v342_v23 = vadd.s32 %v341_v49, %v337_v14  ;;  %vm545_vm15 = vcmp.eq.s32.totalorder %v543_v3, 0  ;;  %vm548_vm2 = vcmp.eq.s32.totalorder %v543_v3, 2 }
  0xd1   :  { %vm744_vm6 = vcmp.lt.s32.totalorder %v743_v18, 0  ;;  %vm239_vm12 = vcmp.eq.s32.totalorder %v234_v9, 2  ;;  %vm235_vm0 = vcmp.lt.s32.totalorder %v234_v9, 2  ;;  %vm236_vm1 = vcmp.eq.s32.totalorder %v234_v9, 0 }
  0xd2   :  { %v198_v20 = vsel %vm744_vm6, 0, %v743_v18  ;;  %v343_v31 = vadd.s32 536870912, %v342_v23 }
  0xd3   :  { %v199_v24 = vsub.s32 32, %v198_v20  ;;  %v203_v25 = vsub.s32 4294967266, %v198_v20  ;;  %v200_v21 = vshll.u32 %v191_v1, %v198_v20 }
  0xd4   :  { %v1036_v26 = vshrl.u32 %v343_v31, 30 }
  0xd5   :  { %v201_v22 = vshrl.u32 %v183_v58, %v199_v24  ;;  %v204_v39 = vadd.s32 127, %v203_v25 }
  0xd6   :  { %v345_v29 = vshll.u32 %v1036_v26, 30  ;;  %v368_v58 = vsub.s32 4, %v1036_v26 }
  0xd7   :  { %v202_v27 = vor.u32 %v201_v22, %v200_v21  ;;  %v205_v28 = vshll.u32 %v204_v39, 23 }
  0xd8   :  { %v346_v32 = vsub.s32 %v342_v23, %v345_v29 }
  0xd9   :  { %v206_v34 = vor.u32 4788187, %v205_v28  ;;  %v209_v37 = vcvt.s32.f32 %v202_v27 }
  0xda   :  { %vm347_vm7 = vcmp.lt.s32.totalorder %v346_v32, 0  ;;  %v348_v38 = vsub.s32 0, %v346_v32 }
  0xdb   :  { %v207_v36 = vand.u32 2147483647, %v206_v34  ;;  %v369_v34 = vsel %vm246_vm11, %v368_v58, %v1036_v26 }
  0xdc   :  { %v349_v7 = vsel %vm347_vm7, %v348_v38, %v346_v32 }
  0xdd   :  { %v210_v41 = vmul.f32 %v209_v37, %v207_v36  ;;  %v350_v42 = vclz %v349_v7  ;;  %v371_v37 = vsel %vm1048_vm14, 0, %v369_v34 }
  0xde   :  { %v697_v51 = vand.u32 3, %v371_v37 }
  0xdf   :  { %v211_v8 = vxor.u32 2147483648, %v210_v41  ;;  %v746_v45 = vadd.s32 4294967294, %v350_v42 }
  0xe0   :  { %vm698_vm6 = vcmp.lt.s32.totalorder %v697_v51, 2  ;;  %vm699_vm7 = vcmp.eq.s32.totalorder %v697_v51, 0 }
  0xe1   :  { %v212_v44 = vsel %vm91_vm8, %v211_v8, %v210_v41  ;;  %vm747_vm10 = vcmp.lt.s32.totalorder %v746_v45, 0  ;;  %v388_v8 = vadd.s32 3, %v371_v37  ;;  %vm702_vm8 = vcmp.eq.s32.totalorder %v697_v51, 2 }
  0xe2   :  { %v215_v46 = vsel %vm90_vm9, %v898_v11, %v212_v44  ;;  %v353_v53 = vsel %vm747_vm10, 0, %v746_v45  ;;  %vm387_vm10 = vweird.f32 %v900_v12 }
  0xe3   :  { %v217_v33 = vmul.f32 %v215_v46, %v215_v46  ;;  %v354_v57 = vsub.s32 32, %v353_v53  ;;  %v358_v59 = vsub.s32 4294967266, %v353_v53  ;;  %v355_v1 = vshll.u32 %v346_v32, %v353_v53 }
  0xe5   :  { %v218_v54 = vmul.f32 -0.001358992, %v217_v33  ;;  %v225_v50 = vmul.f32 -0.00019511016, %v217_v33  ;;  %v356_v63 = vshrl.u32 %v338_v56, %v354_v57  ;;  %v359_v15 = vadd.s32 127, %v358_v59 }
  0xe7   :  { %v219_v61 = vadd.f32 0.041655596, %v218_v54  ;;  %v226_v62 = vadd.f32 0.008332121, %v225_v50  ;;  %v357_v4 = vor.u32 %v356_v63, %v355_v1  ;;  %v360_v5 = vshll.u32 %v359_v15, 23 }
  0xe9   :  { %v220_v30 = vmul.f32 %v219_v61, %v217_v33  ;;  %v227_v55 = vmul.f32 %v226_v62, %v217_v33  ;;  %v361_v47 = vor.u32 4788187, %v360_v5  ;;  %v364_v13 = vcvt.s32.f32 %v357_v4 }
  0xeb   :  { %v221_v35 = vadd.f32 -0.4999988, %v220_v30  ;;  %v228_v40 = vadd.f32 -0.16666654, %v227_v55  ;;  %v362_v10 = vand.u32 2147483647, %v361_v47 }
  0xed   :  { %v222_v48 = vmul.f32 %v221_v35, %v217_v33  ;;  %v229_v6 = vmul.f32 %v228_v40, %v217_v33  ;;  %v365_v0 = vmul.f32 %v364_v13, %v362_v10 }
  0xef   :  { %v223_v52 = vadd.f32 1.0, %v222_v48  ;;  %v230_v17 = vadd.f32 1.0, %v229_v6  ;;  %v366_v49 = vxor.u32 2147483648, %v365_v0 }
  0xf1   :  { %v231_v18 = vmul.f32 %v230_v17, %v215_v46  ;;  %v240_v19 = vxor.u32 2147483648, %v223_v52  ;;  %v367_v24 = vsel %vm246_vm11, %v366_v49, %v365_v0  ;;  %v389_v46 = vand.u32 3, %v388_v8 }
  0xf2   :  { %v370_v16 = vsel %vm1048_vm14, %v900_v12, %v367_v24  ;;  %vm715_vm11 = vcmask 523264  }
  0xf3   :  { %v237_v20 = vxor.u32 2147483648, %v231_v18  ;;  %v241_v23 = vsel %vm239_vm12, %v240_v19, %v231_v18  ;;  %v550_v31 = vsel %vm548_vm2, %v240_v19, %v231_v18  ;;  %v372_v27 = vmul.f32 %v370_v16, %v370_v16 }
  0xf4   :  { %vm394_vm5 = vcmp.eq.s32.totalorder %v389_v46, 2  ;;  %vm391_vm4 = vcmp.eq.s32.totalorder %v389_v46, 0  ;;  %vm390_vm9 = vcmp.lt.s32.totalorder %v389_v46, 2 }
  0xf5   :  { %v547_v25 = vsel %vm545_vm15, %v223_v52, %v237_v20  ;;  %v238_v21 = vsel %vm236_vm1, %v223_v52, %v237_v20  ;;  %v373_v32 = vmul.f32 -0.001358992, %v372_v27  ;;  %v380_v36 = vmul.f32 -0.00019511016, %v372_v27 }
  0xf6   :  { %v551_v22 = vsel %vm544_vm13, %v547_v25, %v550_v31  ;;  %v242_v39 = vsel %vm235_vm0, %v238_v21, %v241_v23 }
  0xf7   :  { %v552_v28 = vsel %vm232_vm3, nan, %v551_v22  ;;  %v243_v29 = vsel %vm232_vm3, nan, %v242_v39  ;;  %v374_v38 = vadd.f32 0.041655596, %v373_v32  ;;  %v381_v11 = vadd.f32 0.008332121, %v380_v36 }
  0xf8   :  { %709 = vrot.lane.b32.xlu0 %v552_v28, %s861_s2 }
  0xf9   :  { %v375_v41 = vmul.f32 %v374_v38, %v372_v27  ;;  %v382_v7 = vmul.f32 %v381_v11, %v372_v27 }
  0xfb   :  { %v376_v42 = vadd.f32 -0.4999988, %v375_v41  ;;  %v383_v43 = vadd.f32 -0.16666654, %v382_v7 }
  0xfd   :  { %v377_v44 = vmul.f32 %v376_v42, %v372_v27  ;;  %v384_v45 = vmul.f32 %v383_v43, %v372_v27 }
  0xff   :  { %v378_v33 = vadd.f32 1.0, %v377_v44  ;;  %v385_v26 = vadd.f32 1.0, %v384_v45 }
 0x101   :  { %v386_v53 = vmul.f32 %v385_v26, %v370_v16  ;;  %v395_v54 = vxor.u32 2147483648, %v378_v33 }
 0x103   :  { %v392_v50 = vxor.u32 2147483648, %v386_v53  ;;  %v396_v56 = vsel %vm394_vm5, %v395_v54, %v386_v53  ;;  %v704_v60 = vsel %vm702_vm8, %v395_v54, %v386_v53 }
 0x105   :  { %v393_v57 = vsel %vm391_vm4, %v378_v33, %v392_v50  ;;  %v701_v59 = vsel %vm699_vm7, %v378_v33, %v392_v50 }
 0x106   :  { %v397_v61 = vsel %vm390_vm9, %v393_v57, %v396_v56  ;;  %v705_v62 = vsel %vm698_vm6, %v701_v59, %v704_v60 }
 0x107   :  { %v398_v63 = vsel %vm387_vm10, nan, %v397_v61  ;;  %v706_v1 = vsel %vm387_vm10, nan, %v705_v62 }
 0x108   :  { %711 = vrot.lane.b32.xlu0 %v706_v1, %s861_s2 }
 0x16a   :  { %v710_v15 = vpop.permute.xlu0 %709 }
 0x16b   :  { %v716_v30 = vsel %vm715_vm11, %v243_v29, %v710_v15 }
 0x16c   :  { %718 = vst [vmem:[#allocation7] sm:$0xff] %v716_v30 }
 0x17a   :  { %v712_v55 = vpop.permute.xlu0 %711 }
 0x17b   :  { %v717_v12 = vsel %vm715_vm11, %v398_v63, %v712_v55 }
 0x17c   :  { %719 = vst [vmem:[#allocation7 + $0x8] sm:$0xff] %v717_v12 }
 0x17d   :  { %732 = dma.vmem_to_hbm [thread:$0]  %s725_s25, 256, %s727_s28, [#allocation4], %s851_s20, %s851_s20, %s852_s21  }
 0x17e   :  { %848 = dma.done.wait [#allocation4], 256  }
 0x17f   :  { %849 = vsyncadd [#allocation4], 4294967040 }
 0x180   :  { %737 = vsyncpa [#allocation3], 1 }
 0x181   :  { %738 = vsyncpa [#allocation6], 1 }
 0x182   :  { %739 = vsyncpa [#allocation4], 1 }

</bundles_post_ra>
